<compile_context>
chip_gen: v7x
topology: tpu7x:2x2x1
jax: 0.10.0
libtpu: 0.0.40
codegen_flags: <defaults>
</compile_context>

<pallas_src>
from functools import partial

import jax
import jax.numpy as jnp
import numpy as np
from jax.experimental import pallas as pl
from jax.experimental.pallas import tpu as pltpu


def cnn_block_kernel(p_ref, w_ref, o_ref, *, N, HW, eps, use_act):
    # p_ref: (Cin*K*K, N*H*W) bf16 im2col patches, batch folded into the lane axis
    # w_ref: (Cout, Cin*K*K)  bf16 repacked conv weights
    # o_ref: (N, Cout, H*W)   flattened-NCHW output (lane-dense: H*W in lanes)

    # One MXU matmul for the whole batch; f32 accumulation.
    acc = jnp.dot(w_ref[...], p_ref[...],
                  preferred_element_type=jnp.float32)          # (Cout, N*HW) f32

    inv_hw = 1.0 / HW                                           # compile-time constant

    # InstanceNorm2d(affine=False) + ReLU per sample. HW is a multiple of 128, so each
    # per-sample lane slice is 128-aligned, the reductions are full-lane XLU reduces,
    # and the stores are unmasked full-lane vst's. N is tiny -> static unroll.
    for n in range(N):
        a = acc[:, n * HW:(n + 1) * HW]                         # (Cout, HW) f32
        # One-pass moments: the two reduces are independent (better ILP than
        # mean -> center -> square -> reduce).
        s = jnp.sum(a, axis=1, keepdims=True)                   # (Cout, 1)
        ss = jnp.sum(a * a, axis=1, keepdims=True)               # (Cout, 1)
        mean = s * inv_hw
        var = ss * inv_hw - mean * mean                          # biased variance
        scale = jax.lax.rsqrt(var + eps)                         # EUP rsqrt
        shift = -mean * scale
        y = a * scale + shift                                    # single fused pass
        if use_act:
            y = jnp.maximum(y, 0.0)
        o_ref[n] = y.astype(o_ref.dtype)


def cnn_block_forward(x_nchw, weight_oikk, bias=None, *, padding=1, eps=1e-5,
                      use_act=True, matmul_dtype=jnp.bfloat16):
    """CNNBlock forward (down=True path). x: (N, Cin, H, W); weight: (Cout, Cin, K, K).

    `bias` is accepted for interface parity with nn.Conv2d but is unused:
    InstanceNorm2d(affine=False) subtracts the per-(n, c) spatial mean, so a
    per-channel constant bias is mathematically a no-op.
    """
    del bias  # cancelled exactly by the InstanceNorm mean subtraction
    N, Cin, H, W = x_nchw.shape
    Cout, _, K, Kw = weight_oikk.shape
    assert K == Kw, "square kernels only"
    HW = H * W
    CKK = Cin * K * K

    # ---- wrapper-side layout plumbing: reflect pad + im2col + weight repack ----
    xp = jnp.pad(x_nchw,
                 ((0, 0), (0, 0), (padding, padding), (padding, padding)),
                 mode="reflect")                                 # (N, Cin, Hp, Wp)
    # P[n, ci*K*K + kh*K + kw, h*W + w] = xp[n, ci, h+kh, w+kw]   (stride 1)
    taps = [xp[:, :, kh:kh + H, kw:kw + W] for kh in range(K) for kw in range(K)]
    P = jnp.stack(taps, axis=2).reshape(N, CKK, HW)
    # Fold the batch into the matmul's lane dimension: (CKK, N*HW).
    P = jnp.transpose(P, (1, 0, 2)).reshape(CKK, N * HW).astype(matmul_dtype)
    w_mat = weight_oikk.reshape(Cout, CKK).astype(matmul_dtype)

    out = pl.pallas_call(
        partial(cnn_block_kernel, N=N, HW=HW, eps=eps, use_act=use_act),
        out_shape=jax.ShapeDtypeStruct((N, Cout, HW), x_nchw.dtype),
        # Whole arrays comfortably fit in VMEM at these shapes; a grid would only
        # add per-step pipeline overhead.
        in_specs=[pl.BlockSpec(memory_space=pltpu.MemorySpace.VMEM),
                  pl.BlockSpec(memory_space=pltpu.MemorySpace.VMEM)],
        out_specs=pl.BlockSpec(memory_space=pltpu.MemorySpace.VMEM),
        # TODO(synk): for production-scale H/W/channels, switch to a row-tiled grid
        # with a K-1 halo, two-pass (sum/sumsq scratch) InstanceNorm, >=2 "parallel"
        # blocks (v7x dual TensorCore), and raise vmem_limit_bytes accordingly.
    )(P, w_mat)

    return out.reshape(N, Cout, H, W)   # pure reshape -> NCHW, no transpose pass


def _reference(x_nchw, weight_oikk, bias, *, padding=1, eps=1e-5,
               conv_dtype=jnp.float32, use_act=True):
    """Pure-JAX reference (reflect-pad conv + InstanceNorm + ReLU)."""
    xp = jnp.pad(x_nchw,
                 ((0, 0), (0, 0), (padding, padding), (padding, padding)),
                 mode="reflect")
    y = jax.lax.conv_general_dilated(
        xp.astype(conv_dtype).astype(jnp.float32),
        weight_oikk.astype(conv_dtype).astype(jnp.float32),
        window_strides=(1, 1),
        padding="VALID",
        dimension_numbers=("NCHW", "OIHW", "NCHW"),
        precision=jax.lax.Precision.HIGHEST,
    ) + bias.astype(jnp.float32)[None, :, None, None]
    mean = jnp.mean(y, axis=(2, 3), keepdims=True)
    var = jnp.mean((y - mean) ** 2, axis=(2, 3), keepdims=True)
    y = (y - mean) * jax.lax.rsqrt(var + eps)
    if use_act:
        y = jnp.maximum(y, 0.0)
    return y


if __name__ == "__main__":
    key = jax.random.PRNGKey(0)
    k_x, k_w, k_b = jax.random.split(key, 3)

    N, Cin, H, W = 2, 4, 16, 16
    Cout, K = 8, 3

    x = jax.random.normal(k_x, (N, Cin, H, W), dtype=jnp.float32)
    # Deterministic synthetic params (shapes match nn.Conv2d(4, 8, 3, 1, 1)).
    fan_in = Cin * K * K
    weight = jax.random.uniform(
        k_w, (Cout, Cin, K, K), dtype=jnp.float32,
        minval=-1.0 / np.sqrt(fan_in), maxval=1.0 / np.sqrt(fan_in))
    bias = jax.random.uniform(
        k_b, (Cout,), dtype=jnp.float32,
        minval=-1.0 / np.sqrt(fan_in), maxval=1.0 / np.sqrt(fan_in))

    out = jax.block_until_ready(
        cnn_block_forward(x, weight, bias, padding=1, eps=1e-5, use_act=True))
    assert out.shape == (N, Cout, H, W), out.shape

    # Tight check vs a reference that rounds the conv inputs to bf16 like the kernel
    # (same math up to f32 accumulation order / one-pass variance).
    ref_bf16 = jax.block_until_ready(
        _reference(x, weight, bias, padding=1, eps=1e-5,
                   conv_dtype=jnp.bfloat16, use_act=True))
    np.testing.assert_allclose(np.asarray(out), np.asarray(ref_bf16),
                               atol=1e-4, rtol=1e-4)

    # Loose check vs the full-f32 module semantics (bf16 MXU inputs introduce
    # O(1e-2) deviations on unit-variance outputs).
    ref_f32 = jax.block_until_ready(
        _reference(x, weight, bias, padding=1, eps=1e-5,
                   conv_dtype=jnp.float32, use_act=True))
    np.testing.assert_allclose(np.asarray(out), np.asarray(ref_f32),
                               atol=5e-2, rtol=5e-2)

    print("KERNEL_OK")
</pallas_src>

<mosaic_0001>
module attributes {stable_mosaic.version = 11 : i64} {
  func.func @cnn_block_kernel(%arg0: memref<36x512xbf16, #tpu.memory_space<vmem>>, %arg1: memref<8x36xbf16, #tpu.memory_space<vmem>>, %arg2: memref<2x8x256xf32, #tpu.memory_space<vmem>>) attributes {dimension_semantics = [], scalar_prefetch = 0 : i64, scratch_operands = 0 : i64, tpu.core_type = #tpu.core_type<tc>} {
    %c0 = arith.constant 0 : index
    %c0_0 = arith.constant 0 : index
    %0 = vector.load %arg1[%c0, %c0_0] : memref<8x36xbf16, #tpu.memory_space<vmem>>, vector<8x36xbf16>
    %c0_1 = arith.constant 0 : index
    %c0_2 = arith.constant 0 : index
    %1 = vector.load %arg0[%c0_1, %c0_2] : memref<36x512xbf16, #tpu.memory_space<vmem>>, vector<36x512xbf16>
    %cst = arith.constant dense<0.000000e+00> : vector<8x512xf32>
    %2 = tpu.matmul %0, %1, %cst {dimension_numbers = #tpu.dot_dimension_numbers<[1], [0], [0], [1], [0, 0, 1, 1], [], []>} : vector<8x36xbf16>, vector<36x512xbf16>, vector<8x512xf32> -> vector<8x512xf32>
    %3 = vector.extract_strided_slice %2 {offsets = [0, 0], sizes = [8, 256], strides = [1, 1]} : vector<8x512xf32> to vector<8x256xf32>
    %cst_3 = arith.constant dense<0.000000e+00> : vector<8xf32>
    %4 = vector.multi_reduction <add>, %3, %cst_3 [1] : vector<8x256xf32> to vector<8xf32>
    %5 = vector.shape_cast %4 : vector<8xf32> to vector<8x1xf32>
    %6 = arith.mulf %3, %3 : vector<8x256xf32>
    %cst_4 = arith.constant dense<0.000000e+00> : vector<8xf32>
    %7 = vector.multi_reduction <add>, %6, %cst_4 [1] : vector<8x256xf32> to vector<8xf32>
    %8 = vector.shape_cast %7 : vector<8xf32> to vector<8x1xf32>
    %cst_5 = arith.constant 3.906250e-03 : f32
    %9 = vector.broadcast %cst_5 : f32 to vector<8x1xf32>
    %10 = arith.mulf %5, %9 : vector<8x1xf32>
    %cst_6 = arith.constant 3.906250e-03 : f32
    %11 = vector.broadcast %cst_6 : f32 to vector<8x1xf32>
    %12 = arith.mulf %8, %11 : vector<8x1xf32>
    %13 = arith.mulf %10, %10 : vector<8x1xf32>
    %14 = arith.subf %12, %13 : vector<8x1xf32>
    %cst_7 = arith.constant 9.99999974E-6 : f32
    %15 = vector.broadcast %cst_7 : f32 to vector<8x1xf32>
    %16 = arith.addf %14, %15 : vector<8x1xf32>
    %17 = math.rsqrt %16 : vector<8x1xf32>
    %cst_8 = arith.constant 0.000000e+00 : f32
    %18 = vector.broadcast %cst_8 : f32 to vector<8x1xf32>
    %19 = arith.subf %18, %10 : vector<8x1xf32>
    %20 = arith.mulf %19, %17 : vector<8x1xf32>
    %21 = vector.broadcast %17 : vector<8x1xf32> to vector<8x256xf32>
    %22 = arith.mulf %3, %21 : vector<8x256xf32>
    %23 = vector.broadcast %20 : vector<8x1xf32> to vector<8x256xf32>
    %24 = arith.addf %22, %23 : vector<8x256xf32>
    %cst_9 = arith.constant 0.000000e+00 : f32
    %25 = vector.broadcast %cst_9 : f32 to vector<8x256xf32>
    %26 = arith.maximumf %24, %25 : vector<8x256xf32>
    %c0_10 = arith.constant 0 : index
    %c0_11 = arith.constant 0 : index
    %c0_12 = arith.constant 0 : index
    %27 = vector.load %arg2[%c0_10, %c0_11, %c0_12] : memref<2x8x256xf32, #tpu.memory_space<vmem>>, vector<1x8x256xf32>
    %28 = vector.shape_cast %27 : vector<1x8x256xf32> to vector<8x256xf32>
    %29 = vector.shape_cast %26 : vector<8x256xf32> to vector<1x8x256xf32>
    tpu.vector_store %arg2[%c0_10, %c0_11, %c0_12], %29 {strides = array<i32>} : memref<2x8x256xf32, #tpu.memory_space<vmem>>, vector<1x8x256xf32>,
    %30 = vector.extract_strided_slice %2 {offsets = [0, 256], sizes = [8, 256], strides = [1, 1]} : vector<8x512xf32> to vector<8x256xf32>
    %cst_13 = arith.constant dense<0.000000e+00> : vector<8xf32>
    %31 = vector.multi_reduction <add>, %30, %cst_13 [1] : vector<8x256xf32> to vector<8xf32>
    %32 = vector.shape_cast %31 : vector<8xf32> to vector<8x1xf32>
    %33 = arith.mulf %30, %30 : vector<8x256xf32>
    %cst_14 = arith.constant dense<0.000000e+00> : vector<8xf32>
    %34 = vector.multi_reduction <add>, %33, %cst_14 [1] : vector<8x256xf32> to vector<8xf32>
    %35 = vector.shape_cast %34 : vector<8xf32> to vector<8x1xf32>
    %cst_15 = arith.constant 3.906250e-03 : f32
    %36 = vector.broadcast %cst_15 : f32 to vector<8x1xf32>
    %37 = arith.mulf %32, %36 : vector<8x1xf32>
    %cst_16 = arith.constant 3.906250e-03 : f32
    %38 = vector.broadcast %cst_16 : f32 to vector<8x1xf32>
    %39 = arith.mulf %35, %38 : vector<8x1xf32>
    %40 = arith.mulf %37, %37 : vector<8x1xf32>
    %41 = arith.subf %39, %40 : vector<8x1xf32>
    %cst_17 = arith.constant 9.99999974E-6 : f32
    %42 = vector.broadcast %cst_17 : f32 to vector<8x1xf32>
    %43 = arith.addf %41, %42 : vector<8x1xf32>
    %44 = math.rsqrt %43 : vector<8x1xf32>
    %cst_18 = arith.constant 0.000000e+00 : f32
    %45 = vector.broadcast %cst_18 : f32 to vector<8x1xf32>
    %46 = arith.subf %45, %37 : vector<8x1xf32>
    %47 = arith.mulf %46, %44 : vector<8x1xf32>
    %48 = vector.broadcast %44 : vector<8x1xf32> to vector<8x256xf32>
    %49 = arith.mulf %30, %48 : vector<8x256xf32>
    %50 = vector.broadcast %47 : vector<8x1xf32> to vector<8x256xf32>
    %51 = arith.addf %49, %50 : vector<8x256xf32>
    %cst_19 = arith.constant 0.000000e+00 : f32
    %52 = vector.broadcast %cst_19 : f32 to vector<8x256xf32>
    %53 = arith.maximumf %51, %52 : vector<8x256xf32>
    %c1 = arith.constant 1 : index
    %c0_20 = arith.constant 0 : index
    %c0_21 = arith.constant 0 : index
    %54 = vector.load %arg2[%c1, %c0_20, %c0_21] : memref<2x8x256xf32, #tpu.memory_space<vmem>>, vector<1x8x256xf32>
    %55 = vector.shape_cast %54 : vector<1x8x256xf32> to vector<8x256xf32>
    %56 = vector.shape_cast %53 : vector<8x256xf32> to vector<1x8x256xf32>
    tpu.vector_store %arg2[%c1, %c0_20, %c0_21], %56 {strides = array<i32>} : memref<2x8x256xf32, #tpu.memory_space<vmem>>, vector<1x8x256xf32>,
    return
  }
}

</mosaic_0001>

<bundles_post_ra>
// kernel: tpu_custom_call.1
= control target key start
LH: loop header
LB: loop body
LE: loop exit
PB: predicated region body
PF: predicated region fallthrough
CT: control target
= control target key end

     0   :  { %7 = vsyncpa [#allocation3], 0  ;;  %s447_s0 = inlined_call_operand.hbm [shape: bf16[36,512], index: 0, kind: input, shape index: {}]   ;;  %s448_s1 = inlined_call_operand.hbm [shape: bf16[8,36], index: 1, kind: input, shape index: {}]   ;;  %s449_s2 = inlined_call_operand.hbm [shape: f32[2,8,256], index: 2, kind: output, shape index: {}]  }
   0x1   :  { %8 = vsyncpa [#allocation6], 0 }
   0x2   :  { %9 = vsyncpa [#allocation4], 0  ;;  %s380_s9 = smov [#allocation2]   ;;  %s308_s13 = scalar_lea.hbm %s447_s0, 1280 }
   0x3   :  { %s15_s10 = sshll.u32 %s380_s9, 4  ;;  %p309_p0 = scmp.ne.s32.totalorder %s447_s0, %s308_s13  ;;  %s16_s10 = int_to_ptr.vmem [resolvable:$true] %s15_s10 }
   0x4   :  { %p312_p1 = scmp.lt.u32.totalorder %s308_s13, %s447_s0 }
   0x6   :  { %p314_p2 = pnand %p312_p1, %p309_p0 }
   0x8   :  { %317 = shalt.err (!%p314_p2)
}
   0x9   :  { %s318_s18 = scalar_lea.vmem %s16_s10, 1280  ;;  %p323_p4 = scmp.lt.s32.totalorder %s16_s10, %s16_s10 }
   0xa   :  { %p319_p3 = scmp.ne.s32.totalorder %s16_s10, %s318_s18  ;;  %p324_p5 = scmp.lt.s32.totalorder %s318_s18, %s318_s18 }
   0xc   :  { %p325_p6 = por %p324_p5, %p323_p4 }
   0xe   :  { %p326_p7 = pnand %p325_p6, %p319_p3 }
  0x10   :  { %329 = shalt.err (!%p326_p7)
}
  0x11   :  { %s381_s19 = smov 256   ;;  %s382_s20 = smov 16  }
  0x12   :  { %21 = dma.hbm_to_vmem [thread:$0]  %s447_s0, 1280, %s16_s10, [#allocation3], %s381_s19, %s381_s19, %s382_s20  }
  0x13   :  { %s383_s23 = smov [#allocation5]   ;;  %s330_s27 = scalar_lea.hbm %s448_s1, 64 }
  0x14   :  { %s28_s24 = sshll.u32 %s383_s23, 4  ;;  %p331_p8 = scmp.ne.s32.totalorder %s448_s1, %s330_s27  ;;  %s29_s24 = int_to_ptr.vmem [resolvable:$true] %s28_s24 }
  0x15   :  { %p334_p9 = scmp.lt.u32.totalorder %s330_s27, %s448_s1 }
  0x17   :  { %p336_p10 = pnand %p334_p9, %p331_p8 }
  0x19   :  { %339 = shalt.err (!%p336_p10)
}
  0x1a   :  { %s340_s4 = scalar_lea.vmem %s29_s24, 64  ;;  %p345_p12 = scmp.lt.s32.totalorder %s29_s24, %s29_s24 }
  0x1b   :  { %p341_p11 = scmp.ne.s32.totalorder %s29_s24, %s340_s4  ;;  %p346_p13 = scmp.lt.s32.totalorder %s340_s4, %s340_s4 }
  0x1d   :  { %p347_p0 = por %p346_p13, %p345_p12 }
  0x1f   :  { %p348_p1 = pnand %p347_p0, %p341_p11 }
  0x21   :  { %351 = shalt.err (!%p348_p1)
}
  0x22   :  { %31 = dma.hbm_to_vmem [thread:$0]  %s448_s1, 64, %s29_s24, [#allocation6]  }
  0x23   :  { %374 = dma.done.wait [#allocation3], 1280  }
  0x24   :  { %375 = vsyncadd [#allocation3], 4294966016 }
  0x25   :  { %376 = dma.done.wait [#allocation6], 64  }
  0x26   :  { %377 = vsyncadd [#allocation6], 4294967232  ;;  %v384_v0 = vmov 0   ;;  %v288_v1 = vld [vmem:[#allocation2 + $0x4] ss:$16 sps:$4 sm:$0xff]   ;;  %vm104_vm0 = vcmask 1041408  }
  0x27   :  { %149 = vmatprep.mubr.bf16.mxu0 %v384_v0  ;;  %190 = vmatprep.mubr.bf16.mxu1 %v384_v0  ;;  %v290_v2 = vld [vmem:[#allocation2] ss:$16 sps:$4 sm:$0xff]   ;;  %v291_v3 = vld [vmem:[#allocation2 + $0xc] ss:$16 sps:$4 sm:$0xff]   ;;  %v293_v4 = vld [vmem:[#allocation2 + $0x8] ss:$16 sps:$4 sm:$0xff]  }
  0x28   :  { %117 = vmatprep.subr.bf16.mxu0 %v288_v1  ;;  %v294_v5 = vld [vmem:[#allocation2 + $0x24] ss:$16 sps:$4 sm:$0xff]   ;;  %v296_v6 = vld [vmem:[#allocation2 + $0x20] ss:$16 sps:$4 sm:$0xff]   ;;  %158 = vmatprep.subr.bf16.mxu1 %v291_v3  ;;  %v297_v7 = vld [vmem:[#allocation2 + $0x2c] ss:$16 sps:$4 sm:$0xff]  }
  0x29   :  { %118 = vmatpush1.bf16.msra.mxu0 %v290_v2  ;;  %159 = vmatpush1.bf16.msra.mxu1 %v293_v4  ;;  %v299_v8 = vld [vmem:[#allocation2 + $0x28] ss:$16 sps:$4 sm:$0xff]   ;;  %v48_v9 = vld [vmem:[#allocation2 + $0x40] sm:$0x33]  ;;  %v39_v17 = vld [vmem:[#allocation5] sm:$0xf] }
  0x2a   :  { %119 = vmatprep.subr.bf16.mxu0 %v294_v5  ;;  %v49_v10 = vld [vmem:[#allocation2 + $0x48] sm:$0x33]  ;;  %160 = vmatprep.subr.bf16.mxu1 %v297_v7  ;;  %v275_v11 = vcombine.high %v48_v9, %v48_v9  ;;  %v274_v12 = vcombine.low %v48_v9, %v48_v9  ;;  %vm100_vm1 = vcmask 293888   ;;  %s385_s1 = smov [#allocation7]  }
  0x2b   :  { %v277_v13 = vcombine.high %v49_v10, %v49_v10  ;;  %v276_v14 = vcombine.low %v49_v10, %v49_v10  ;;  %s253_s6 = sshll.u32 %s385_s1, 4  ;;  %s254_s6 = int_to_ptr.vmem [resolvable:$true] %s253_s6 }
  0x2c   :  { %v106_v15 = vsel %vm104_vm0, %v274_v12, 0  ;;  %s352_s7 = scalar_lea.vmem %s254_s6, 512  ;;  %p357_p3 = scmp.lt.s32.totalorder %s254_s6, %s254_s6 }
  0x2d   :  { %120 = vmatpush1.bf16.msra.mxu0 %v296_v6  ;;  %161 = vmatpush1.bf16.msra.mxu1 %v299_v8  ;;  %v112_v16 = vsel %vm104_vm0, %v276_v14, 0  ;;  %p353_p2 = scmp.ne.s32.totalorder %s254_s6, %s352_s7  ;;  %p358_p4 = scmp.lt.s32.totalorder %s352_s7, %s352_s7 }
  0x2e   :  { %278 = vmatprep.subr.msk.bf16.mxu0 %vm104_vm0, %v275_v11  ;;  %280 = vmatprep.subr.msk.bf16.mxu1 %vm104_vm0, %v277_v13 }
  0x2f   :  { %p359_p5 = por %p358_p4, %p357_p3 }
  0x31   :  { %122 = vmatpush1.bf16.msra.mxu0 %v106_v15  ;;  %163 = vmatpush1.bf16.msra.mxu1 %v112_v16  ;;  %p360_p6 = pnand %p359_p5, %p353_p2 }
  0x34   :  { %279 = vmatmul.mubr.msk.bf16.vlgmr.msra.gmra.mrb[0].mxu0 %vm100_vm1, %v39_v17  ;;  %281 = vmatmul.mubr.msk.bf16.vlgmr.msra.gmra.mrb[0].mxu1 %vm100_vm1, %v39_v17 }
 0x107   :  { %v151_v18 = vpop.f32.mrb[0].mxu0  ;;  %v192_v21 = vpop.f32.mrb[0].mxu1 }
 0x108   :  { %v153_v19 = vpop.f32.mrb[1].mxu0  ;;  %v202_v20 = vmul.f32 %v151_v18, %v151_v18  ;;  %v194_v25 = vpop.f32.mrb[1].mxu1  ;;  %v226_v27 = vmul.f32 %v192_v21, %v192_v21 }
 0x109   :  { %v155_v22 = vpop.f32.mrb[2].mxu0  ;;  %v199_v23 = vadd.f32 %v153_v19, %v151_v18  ;;  %v203_v24 = vmul.f32 %v153_v19, %v153_v19  ;;  %v196_v28 = vpop.f32.mrb[2].mxu1  ;;  %v223_v30 = vadd.f32 %v194_v25, %v192_v21  ;;  %v227_v31 = vmul.f32 %v194_v25, %v194_v25 }
 0x10a   :  { %v156_v26 = vpop.f32.mrb[3].mxu0  ;;  %v197_v32 = vpop.f32.mrb[3].mxu1 }
 0x10b   :  { %200 = vadd.xlane.f32.xlu0 %v199_v23  ;;  %v204_v29 = vadd.f32 %v203_v24, %v202_v20  ;;  %v228_v33 = vadd.f32 %v227_v31, %v226_v27 }
 0x10d   :  { %205 = vadd.xlane.f32.xlu1 %v204_v29 }
 0x10f   :  { %224 = vadd.xlane.f32.xlu0 %v223_v30 }
 0x111   :  { %229 = vadd.xlane.f32.xlu1 %v228_v33 }
 0x198   :  { %v201_v34 = vpop.xlane.xlu0 %200 }
 0x199   :  { %v207_v35 = vmul.f32 0.00390625, %v201_v34 }
 0x19a   :  { %v206_v36 = vpop.xlane.xlu1 %205 }
 0x19b   :  { %v209_v37 = vmul.f32 %v207_v35, %v207_v35  ;;  %v208_v38 = vmul.f32 0.00390625, %v206_v36  ;;  %v213_v48 = vsub.f32 0.0, %v207_v35 }
 0x19c   :  { %v225_v39 = vpop.xlane.xlu0 %224 }
 0x19d   :  { %v210_v40 = vsub.f32 %v208_v38, %v209_v37  ;;  %v231_v41 = vmul.f32 0.00390625, %v225_v39 }
 0x19e   :  { %v230_v42 = vpop.xlane.xlu1 %229 }
 0x19f   :  { %v211_v43 = vadd.f32 1e-05, %v210_v40  ;;  %v233_v44 = vmul.f32 %v231_v41, %v231_v41  ;;  %v232_v45 = vmul.f32 0.00390625, %v230_v42  ;;  %v237_v53 = vsub.f32 0.0, %v231_v41 }
 0x1a1   :  { %304 = vrsqrt.f32 %v211_v43  ;;  %v234_v46 = vsub.f32 %v232_v45, %v233_v44 }
 0x1a3   :  { %v235_v47 = vadd.f32 1e-05, %v234_v46 }
 0x1a5   :  { %306 = vrsqrt.f32 %v235_v47 }
 0x1ab   :  { %v305_v49 = vpop.eup %304 }
 0x1ac   :  { %v214_v50 = vmul.f32 %v305_v49, %v213_v48  ;;  %v215_v51 = vmul.f32 %v305_v49, %v151_v18  ;;  %v216_v52 = vmul.f32 %v305_v49, %v153_v19 }
 0x1ae   :  { %v217_v54 = vadd.f32 %v215_v51, %v214_v50  ;;  %v218_v55 = vadd.f32 %v216_v52, %v214_v50 }
 0x1af   :  { %v307_v56 = vpop.eup %306 }
 0x1b0   :  { %v219_v57 = vmax.f32 %v217_v54, 0.0  ;;  %v220_v58 = vmax.f32 %v218_v55, 0.0  ;;  %v238_v59 = vmul.f32 %v307_v56, %v237_v53  ;;  %v239_v60 = vmul.f32 %v307_v56, %v192_v21 }
 0x1b1   :  { %v240_v61 = vmul.f32 %v307_v56, %v194_v25 }
 0x1b2   :  { %221 = vst [vmem:[#allocation7] sm:$0xff] %v219_v57  ;;  %222 = vst [vmem:[#allocation7 + $0x8] sm:$0xff] %v220_v58  ;;  %v241_v62 = vadd.f32 %v239_v60, %v238_v59 }
 0x1b3   :  { %v242_v63 = vadd.f32 %v240_v61, %v238_v59 }
 0x1b4   :  { %v243_v0 = vmax.f32 %v241_v62, 0.0 }
 0x1b5   :  { %v244_v1 = vmax.f32 %v242_v63, 0.0 }
 0x1b6   :  { %246 = vst [vmem:[#allocation7 + $0x10] sm:$0xff] %v243_v0 }
 0x1b7   :  { %247 = vst [vmem:[#allocation7 + $0x18] sm:$0xff] %v244_v1 }
 0x1b8   :  { %363 = shalt.err (!%p360_p6)
}
 0x1b9   :  { %s364_s10 = scalar_lea.hbm %s449_s2, 512 }
 0x1ba   :  { %p365_p7 = scmp.ne.s32.totalorder %s449_s2, %s364_s10  ;;  %p368_p8 = scmp.lt.u32.totalorder %s364_s10, %s449_s2 }
 0x1bc   :  { %p370_p9 = pnand %p368_p8, %p365_p7 }
 0x1be   :  { %373 = shalt.err (!%p370_p9)
}
 0x1bf   :  { %259 = dma.vmem_to_hbm [thread:$0]  %s254_s6, 512, %s449_s2, [#allocation4], %s381_s19, %s381_s19, %s382_s20  }
 0x1c0   :  { %378 = dma.done.wait [#allocation4], 512  }
 0x1c1   :  { %379 = vsyncadd [#allocation4], 4294966784 }
 0x1c2   :  { %263 = vsyncpa [#allocation3], 1 }
 0x1c3   :  { %264 = vsyncpa [#allocation6], 1 }
 0x1c4   :  { %265 = vsyncpa [#allocation4], 1 }

</bundles_post_ra>
